<compile_context>
chip_gen: v7x
topology: tpu7x:2x2x1
jax: 0.10.0
libtpu: 0.0.40
codegen_flags: <defaults>
</compile_context>

<pallas_src>
import math

import jax
import jax.numpy as jnp
from jax.experimental import pallas as pl
from jax.experimental.pallas import tpu as pltpu


def _fused_kernel(x_ref, w_ref, b_ref, o_ref):
    # One folded matmul on the MXU + bias add on the (otherwise idle) VPU.
    o_ref[...] = (jnp.dot(x_ref[...], w_ref[...],
                          preferred_element_type=jnp.float32)
                  + b_ref[...])


def init_params(key, cin=9, h=2, w=2, cout3=153, cout4=32):
    """Random torch-style conv params + the fully folded (W_total, b_total)."""
    hw = h * w
    ks = jax.random.split(key, 8)

    def u(k, shape, fan_in):
        b = 1.0 / math.sqrt(fan_in)
        return jax.random.uniform(k, shape, jnp.float32, -b, b)

    raw = {
        "w3": u(ks[0], (cout3, cin, 3, 3), cin * 9),
        "b3": u(ks[1], (cout3,), cin * 9),
        "w4": u(ks[2], (cout4, cout3, 1, 1), cout3),
        "b4": u(ks[3], (cout4,), cout3),
        "w5": u(ks[4], (1, cin, 1, 1), cin),
        "b5": u(ks[5], (1,), cin),
        "w6": u(ks[6], (1, cin, 1, 1), cin),
        "b6": u(ks[7], (1,), cin),
    }

    # conv3 (3x3, stride 2, pad 1) on a 2x2 input has a single output pixel
    # whose receptive window overlaps the input only at kernel taps [1:, 1:];
    # keep just those, ordered (c, pixel) to match the NCHW-flattened input.
    w3r = raw["w3"][:, :, 1:, 1:].reshape(cout3, cin * hw).T          # (36, 153)
    w4m = raw["w4"].reshape(cout4, cout3).T                           # (153, 32)
    eye_hw = jnp.eye(hw, dtype=jnp.float32)
    # Exact 0/1 broadcast matrices reproducing the NCHW broadcast-add:
    #  rep repeats each output channel over its HW pixels,
    #  tile repeats the per-pixel (v15+v16) value over all output channels.
    rep = jnp.kron(jnp.eye(cout4, dtype=jnp.float32),
                   jnp.ones((1, hw), jnp.float32))                    # (32, 128)
    tile = jnp.tile(eye_hw, (1, cout4))                               # (4, 128)
    # conv5 + conv6 (1x1, pre-summed) acting on the NCHW-flat input.
    w56 = jnp.kron((raw["w5"] + raw["w6"]).reshape(cin, 1), eye_hw)   # (36, 4)

    # Fold the whole chain: out = x_flat @ W_total + b_total.
    w_total = w3r @ w4m @ rep + w56 @ tile                            # (36, 128)
    b_total = ((raw["b3"].reshape(1, cout3) @ w4m
                + raw["b4"].reshape(1, cout4)) @ rep
               + jnp.full((1, hw), raw["b5"][0] + raw["b6"][0],
                          jnp.float32) @ tile)                        # (1, 128)

    params = {"w_total": w_total, "b_total": b_total}
    return params, raw


def model_forward(x_nchw, params):
    n, c, h, w = x_nchw.shape
    assert (h, w) == (2, 2), "reference broadcast only well-defined for H=W=2"
    hw = h * w
    k = c * hw                                  # 36
    m = params["w_total"].shape[1]              # 128 = cout4 * hw
    cout = m // hw

    x_flat = x_nchw.reshape(n, k)               # free NCHW-flatten view

    cost = pl.CostEstimate(
        flops=2 * n * k * m, transcendentals=0,
        bytes_accessed=4 * (n * k + k * m + m + n * m))

    if n % 8 == 0 and n > 8:
        # Larger batches: 1-D grid over sublane-aligned row tiles; rows are
        # independent -> "parallel" so v7x's two TensorCores split the batch.
        bn = 8
        out_flat = pl.pallas_call(
            _fused_kernel,
            out_shape=jax.ShapeDtypeStruct((n, m), jnp.float32),
            grid=(n // bn,),
            in_specs=[pl.BlockSpec((bn, k), lambda i: (i, 0)),
                      pl.BlockSpec((k, m), lambda i: (0, 0)),
                      pl.BlockSpec((1, m), lambda i: (0, 0))],
            out_specs=pl.BlockSpec((bn, m), lambda i: (i, 0)),
            compiler_params=pltpu.CompilerParams(
                dimension_semantics=("parallel",)),
            cost_estimate=cost,
        )(x_flat, params["w_total"], params["b_total"])
    else:
        # Small batch: single grid-free call, everything whole-array in VMEM.
        vmem = pl.BlockSpec(memory_space=pltpu.MemorySpace.VMEM)
        out_flat = pl.pallas_call(
            _fused_kernel,
            out_shape=jax.ShapeDtypeStruct((n, m), jnp.float32),
            in_specs=[vmem, vmem, vmem],
            out_specs=vmem,
            cost_estimate=cost,
        )(x_flat, params["w_total"], params["b_total"])

    return out_flat.reshape(n, cout, h, w)      # back to PyTorch NCHW


def _reference_forward(x, raw):
    """Pure-JAX NCHW reference of the returned value (for validation)."""
    dn = ("NCHW", "OIHW", "NCHW")
    v13 = jax.lax.conv_general_dilated(x, raw["w3"], (2, 2), ((1, 1), (1, 1)),
                                       dimension_numbers=dn) \
        + raw["b3"][None, :, None, None]
    v14 = jax.lax.conv_general_dilated(v13, raw["w4"], (1, 1), "VALID",
                                       dimension_numbers=dn) \
        + raw["b4"][None, :, None, None]
    v15 = jax.lax.conv_general_dilated(x, raw["w5"], (1, 1), "VALID",
                                       dimension_numbers=dn) \
        + raw["b5"][None, :, None, None]
    v16 = jax.lax.conv_general_dilated(x, raw["w6"], (1, 1), "VALID",
                                       dimension_numbers=dn) \
        + raw["b6"][None, :, None, None]
    return v14 + v15 + v16


if __name__ == "__main__":
    key = jax.random.PRNGKey(0)
    kx, kp = jax.random.split(key)
    # x: (N=8, C=9, H=2, W=2) NCHW -- 9 channels as in the reference x1; batch
    # padded to a full f32 sublane tile (8) per the perf review; H=W=2 is the
    # only non-trivial spatial size for which the module's final broadcast
    # add is well-defined.
    x = jax.random.normal(kx, (8, 9, 2, 2), dtype=jnp.float32)
    params, raw = init_params(kp, cin=9)

    fwd = jax.jit(model_forward)
    out = fwd(x, params)
    jax.block_until_ready(out)

    assert out.shape == (8, 32, 2, 2) and out.dtype == jnp.float32
    ref = _reference_forward(x, raw)
    assert bool(jnp.allclose(out, ref, rtol=1e-3, atol=1e-3)), \
        "Pallas output mismatch vs pure-JAX conv reference"
    print("KERNEL_OK")
</pallas_src>

<mosaic_0001>
module attributes {stable_mosaic.version = 11 : i64} {
  func.func @_fused_kernel(%arg0: memref<8x36xf32, #tpu.memory_space<vmem>>, %arg1: memref<36x128xf32, #tpu.memory_space<vmem>>, %arg2: memref<1x128xf32, #tpu.memory_space<vmem>>, %arg3: memref<8x128xf32, #tpu.memory_space<vmem>>) attributes {dimension_semantics = [], scalar_prefetch = 0 : i64, scratch_operands = 0 : i64, tpu.core_type = #tpu.core_type<tc>} {
    %c0 = arith.constant 0 : index
    %c0_0 = arith.constant 0 : index
    %0 = vector.load %arg0[%c0, %c0_0] : memref<8x36xf32, #tpu.memory_space<vmem>>, vector<8x36xf32>
    %c0_1 = arith.constant 0 : index
    %c0_2 = arith.constant 0 : index
    %1 = vector.load %arg1[%c0_1, %c0_2] : memref<36x128xf32, #tpu.memory_space<vmem>>, vector<36x128xf32>
    %cst = arith.constant dense<0.000000e+00> : vector<8x128xf32>
    %2 = tpu.matmul %0, %1, %cst {dimension_numbers = #tpu.dot_dimension_numbers<[1], [0], [0], [1], [0, 0, 1, 1], [], []>} : vector<8x36xf32>, vector<36x128xf32>, vector<8x128xf32> -> vector<8x128xf32>
    %c0_3 = arith.constant 0 : index
    %c0_4 = arith.constant 0 : index
    %3 = vector.load %arg2[%c0_3, %c0_4] : memref<1x128xf32, #tpu.memory_space<vmem>>, vector<1x128xf32>
    %4 = vector.broadcast %3 : vector<1x128xf32> to vector<8x128xf32>
    %5 = arith.addf %2, %4 : vector<8x128xf32>
    %c0_5 = arith.constant 0 : index
    %c0_6 = arith.constant 0 : index
    %6 = vector.load %arg3[%c0_5, %c0_6] : memref<8x128xf32, #tpu.memory_space<vmem>>, vector<8x128xf32>
    tpu.vector_store %arg3[%c0_5, %c0_6], %5 {strides = array<i32>} : memref<8x128xf32, #tpu.memory_space<vmem>>, vector<8x128xf32>,
    return
  }
}

</mosaic_0001>

<bundles_post_ra>
// kernel: model_forward.1
= control target key start
LH: loop header
LB: loop body
LE: loop exit
PB: predicated region body
PF: predicated region fallthrough
CT: control target
= control target key end

     0   :  { %v141_v0 = vmov 0.0|0.0   ;;  %vm142_vm0 = vmmov 0   ;;  %v143_v4 = vmov 0.0   ;;  %vm31_vm1 = vcmask 1043456   ;;  %s188_s1 = inlined_call_operand.vmem [shape: f32[36,128], index: 1, kind: input, shape index: {}]   ;;  %s189_s0 = inlined_call_operand.vmem [shape: f32[8,36], index: 0, kind: input, shape index: {}]   ;;  %s190_s2 = inlined_call_operand.vmem [shape: f32[1,128], index: 2, kind: input, shape index: {}]   ;;  %s191_s3 = inlined_call_operand.vmem [shape: f32[8,128], index: 3, kind: output, shape index: {}]  }
   0x1   :  { %132 = vmatprep.subr.bf16.mxu0 %v141_v0  ;;  %v15_v1 = vld [vmem:[%s188_s1] sm:$0xff]  ;;  %v16_v2 = vld [vmem:[%s188_s1 + $0x8] sm:$0xff]  ;;  %v17_v3 = vld [vmem:[%s188_s1 + $0x10] sm:$0xff]  ;;  %129 = vmatprep.mubr.msk.f32.mxu0 %vm142_vm0, %v143_v4  ;;  %vm27_vm2 = vcmask 293888  }
   0x2   :  { %v133_v5 = vpack.c.bf16 %v16_v2, %v15_v1  ;;  %v18_v6 = vld [vmem:[%s188_s1 + $0x18] sm:$0xff]  ;;  %v19_v8 = vld [vmem:[%s188_s1 + $0x20] sm:$0xf] }
   0x3   :  { %v136_v7 = vpack.c.bf16 %v18_v6, %v17_v3  ;;  %v14_v9 = vld [vmem:[%s189_s0] sm:$0xff] }
   0x4   :  { %134 = vmatpush3.bf16.msra.mxu0 %v133_v5  ;;  %v110_v10 = vld [vmem:[%s190_s2] ss:$0 sm:$0xff] }
   0x5   :  { %135 = vmatprep.subr.bf16.mxu0 %v141_v0 }
   0x8   :  { %137 = vmatpush3.bf16.msra.mxu0 %v136_v7 }
   0x9   :  { %127 = vmatprep.subr.mxu0 %v143_v4 }
   0xc   :  { %128 = vmatpush3.msk.msra.mxu0 %vm31_vm1, %v19_v8 }
   0xd   :  { %130 = vmatmul.mubr.msk.f32.vlgmr.msra.gmra.mrb[0].mxu0 %vm27_vm2, %v14_v9 }
  0xe0   :  { %v101_v11 = vpop.f32.mrb[0].mxu0 }
  0xe1   :  { %v102_v12 = vadd.f32 %v110_v10, %v101_v11  ;;  %v131_v13 = vpop.f32.mrb[1].mxu0 }
  0xe3   :  { %105 = vst [vmem:[%s191_s3] sm:$0xff] %v102_v12 }

</bundles_post_ra>
